<compile_context>
chip_gen: v7x
topology: tpu7x:2x2x1
jax: 0.10.0
libtpu: 0.0.40
codegen_flags: <defaults>
</compile_context>

<pallas_src>
import jax
import jax.numpy as jnp
from jax.experimental import pallas as pl
from jax.experimental.pallas import tpu as pltpu

H1 = 64      # first hidden width per head
H2 = 16      # second hidden width per head
LANES = 128  # packed hidden width (2*H1) == lane-dense output width


def _policy_kernel(x_ref, w1_ref, w23_ref, b_ref, o_ref):
    x = x_ref[...]                                   # (B, in_dim)
    b1 = b_ref[0:1, :]                               # (1, 128)
    b2 = b_ref[1:2, :]
    b3 = b_ref[2:3, :]

    # Layer 1 (both heads at once): (B, in_dim) @ (in_dim, 128)
    h1 = jnp.dot(x, w1_ref[...], preferred_element_type=jnp.float32) + b1
    h1 = jnp.maximum(h1, 0.0)                        # [action hidden | value hidden]
    # Layer 2 (block-diagonal): (B, 128) @ (128, 128); cols 32.. stay exactly 0.
    h2 = jnp.dot(h1, w23_ref[0], preferred_element_type=jnp.float32) + b2
    h2 = jnp.maximum(h2, 0.0)
    # Layer 3: col 0 -> l0-l1, col 1 -> l1-l0, col 2 -> state value, cols 3.. -> 0.
    out = jnp.dot(h2, w23_ref[1], preferred_element_type=jnp.float32) + b3

    # softmax over 2 logits == sigmoid of the logit difference (exact).
    sig = pl.reciprocal(1.0 + jnp.exp(-out), approx=False)
    col = jax.lax.broadcasted_iota(jnp.int32, out.shape, 1)
    o_ref[...] = jnp.where(col < 2, sig, out)


def policy_forward(x, packed):
    """x: (B, in_dim) float32. packed = (w1p, w23p, bp) from pack_params()."""
    w1p, w23p, bp = packed
    B, in_dim = x.shape
    vmem = pl.BlockSpec(memory_space=pltpu.MemorySpace.VMEM)
    flops = 2 * B * (in_dim * LANES + LANES * LANES + LANES * LANES)
    bytes_accessed = 4 * (x.size + w1p.size + w23p.size + bp.size + B * LANES)
    out = pl.pallas_call(
        _policy_kernel,
        out_shape=jax.ShapeDtypeStruct((B, LANES), jnp.float32),
        in_specs=[vmem, vmem, vmem, vmem],
        out_specs=vmem,
        cost_estimate=pl.CostEstimate(
            flops=flops, transcendentals=B * LANES, bytes_accessed=bytes_accessed),
    )(x, w1p, w23p, bp)
    action_prob = out[:, :2]
    state_values = out[:, 2:3]
    return action_prob, state_values


def init_params(key, in_dim):
    """Deterministic synthetic init. Linear weights stored as (in, out)."""
    ks = jax.random.split(key, 12)

    def lin(kw, kb, fan_in, fan_out):
        # Mimic PyTorch default uniform(-1/sqrt(fan_in), 1/sqrt(fan_in)).
        bound = 1.0 / jnp.sqrt(jnp.float32(fan_in))
        w = jax.random.uniform(kw, (fan_in, fan_out), jnp.float32, -bound, bound)
        b = jax.random.uniform(kb, (1, fan_out), jnp.float32, -bound, bound)
        return w, b

    w1a, b1a = lin(ks[0], ks[1], in_dim, H1)
    w2a, b2a = lin(ks[2], ks[3], H1, H2)
    w3a, b3a = lin(ks[4], ks[5], H2, 2)
    w1v, b1v = lin(ks[6], ks[7], in_dim, H1)
    w2v, b2v = lin(ks[8], ks[9], H1, H2)
    w3v, b3v = lin(ks[10], ks[11], H2, 1)
    return dict(w1a=w1a, b1a=b1a, w2a=w2a, b2a=b2a, w3a=w3a, b3a=b3a,
                w1v=w1v, b1v=b1v, w2v=w2v, b2v=b2v, w3v=w3v, b3v=b3v)


def pack_params(p):
    """Host-side, one-time packing of the 12 Linear params into 3 arrays."""
    # Layer 1: concatenate heads along the output lanes.
    w1p = jnp.concatenate([p["w1a"], p["w1v"]], axis=1)              # (in_dim, 128)
    # Layer 2: block-diagonal, zero-padded to lane-dense width.
    w2p = jnp.zeros((2 * H1, LANES), jnp.float32)
    w2p = w2p.at[:H1, :H2].set(p["w2a"])
    w2p = w2p.at[H1:, H2:2 * H2].set(p["w2v"])
    # Layer 3: col 0 = weights for (l0-l1), col 1 = (l1-l0), col 2 = value head.
    d = p["w3a"][:, 0:1] - p["w3a"][:, 1:2]                          # (16, 1)
    w3p = jnp.zeros((LANES, LANES), jnp.float32)
    w3p = w3p.at[:H2, 0:1].set(d)
    w3p = w3p.at[:H2, 1:2].set(-d)
    w3p = w3p.at[H2:2 * H2, 2:3].set(p["w3v"])
    w23p = jnp.stack([w2p, w3p], axis=0)                             # (2, 128, 128)
    # Biases: single (3, 128) buffer (one row per layer).
    bp = jnp.zeros((3, LANES), jnp.float32)
    bp = bp.at[0, :H1].set(p["b1a"][0]).at[0, H1:].set(p["b1v"][0])
    bp = bp.at[1, :H2].set(p["b2a"][0]).at[1, H2:2 * H2].set(p["b2v"][0])
    db = p["b3a"][0, 0] - p["b3a"][0, 1]
    bp = bp.at[2, 0].set(db).at[2, 1].set(-db).at[2, 2].set(p["b3v"][0, 0])
    return w1p, w23p, bp


def policy_ref(x, p):
    """Pure-JAX reference matching the PyTorch forward (eval mode)."""
    def head(w1, b1, w2, b2, w3, b3):
        h1 = jnp.maximum(x @ w1 + b1, 0.0)
        h2 = jnp.maximum(h1 @ w2 + b2, 0.0)
        return h2 @ w3 + b3
    logits = head(p["w1a"], p["b1a"], p["w2a"], p["b2a"], p["w3a"], p["b3a"])
    action_prob = jax.nn.softmax(logits, axis=-1)
    state_values = head(p["w1v"], p["b1v"], p["w2v"], p["b2v"], p["w3v"], p["b3v"])
    return action_prob, state_values


if __name__ == "__main__":
    # options['out_dim'] = 31  ->  input feature dim = out_dim + 1 = 32
    out_dim = 31
    in_dim = out_dim + 1
    batch = 8

    key = jax.random.PRNGKey(0)
    k_x, k_p = jax.random.split(key)
    x = jax.random.normal(k_x, (batch, in_dim), dtype=jnp.float32)
    params = init_params(k_p, in_dim)
    packed = pack_params(params)   # host-side, once

    action_prob, state_values = policy_forward(x, packed)
    jax.block_until_ready((action_prob, state_values))

    # Sanity check against the pure-JAX reference.
    ref_ap, ref_sv = policy_ref(x, params)
    assert action_prob.shape == (batch, 2)
    assert state_values.shape == (batch, 1)
    assert jnp.allclose(action_prob, ref_ap, atol=1e-5, rtol=1e-5)
    assert jnp.allclose(state_values, ref_sv, atol=1e-5, rtol=1e-5)
    assert jnp.allclose(jnp.sum(action_prob, axis=-1), 1.0, atol=1e-5)

    print("KERNEL_OK")
</pallas_src>

<mosaic_0001>
module attributes {stable_mosaic.version = 11 : i64} {
  func.func @_policy_kernel(%arg0: memref<8x32xf32, #tpu.memory_space<vmem>>, %arg1: memref<32x128xf32, #tpu.memory_space<vmem>>, %arg2: memref<2x128x128xf32, #tpu.memory_space<vmem>>, %arg3: memref<3x128xf32, #tpu.memory_space<vmem>>, %arg4: memref<8x128xf32, #tpu.memory_space<vmem>>) attributes {dimension_semantics = [], scalar_prefetch = 0 : i64, scratch_operands = 0 : i64, tpu.core_type = #tpu.core_type<tc>} {
    %c0 = arith.constant 0 : index
    %c0_0 = arith.constant 0 : index
    %0 = vector.load %arg0[%c0, %c0_0] : memref<8x32xf32, #tpu.memory_space<vmem>>, vector<8x32xf32>
    %c0_1 = arith.constant 0 : index
    %c0_2 = arith.constant 0 : index
    %1 = vector.load %arg3[%c0_1, %c0_2] : memref<3x128xf32, #tpu.memory_space<vmem>>, vector<1x128xf32>
    %c1 = arith.constant 1 : index
    %c0_3 = arith.constant 0 : index
    %2 = vector.load %arg3[%c1, %c0_3] : memref<3x128xf32, #tpu.memory_space<vmem>>, vector<1x128xf32>
    %c2 = arith.constant 2 : index
    %c0_4 = arith.constant 0 : index
    %3 = vector.load %arg3[%c2, %c0_4] : memref<3x128xf32, #tpu.memory_space<vmem>>, vector<1x128xf32>
    %c0_5 = arith.constant 0 : index
    %c0_6 = arith.constant 0 : index
    %4 = vector.load %arg1[%c0_5, %c0_6] : memref<32x128xf32, #tpu.memory_space<vmem>>, vector<32x128xf32>
    %cst = arith.constant dense<0.000000e+00> : vector<8x128xf32>
    %5 = tpu.matmul %0, %4, %cst {dimension_numbers = #tpu.dot_dimension_numbers<[1], [0], [0], [1], [0, 0, 1, 1], [], []>} : vector<8x32xf32>, vector<32x128xf32>, vector<8x128xf32> -> vector<8x128xf32>
    %6 = vector.broadcast %1 : vector<1x128xf32> to vector<8x128xf32>
    %7 = arith.addf %5, %6 : vector<8x128xf32>
    %cst_7 = arith.constant 0.000000e+00 : f32
    %8 = vector.broadcast %cst_7 : f32 to vector<8x128xf32>
    %9 = arith.maximumf %7, %8 : vector<8x128xf32>
    %c0_8 = arith.constant 0 : index
    %c0_9 = arith.constant 0 : index
    %c0_10 = arith.constant 0 : index
    %10 = vector.load %arg2[%c0_8, %c0_9, %c0_10] : memref<2x128x128xf32, #tpu.memory_space<vmem>>, vector<1x128x128xf32>
    %11 = vector.shape_cast %10 : vector<1x128x128xf32> to vector<128x128xf32>
    %cst_11 = arith.constant dense<0.000000e+00> : vector<8x128xf32>
    %12 = tpu.matmul %9, %11, %cst_11 {dimension_numbers = #tpu.dot_dimension_numbers<[1], [0], [0], [1], [0, 0, 1, 1], [], []>} : vector<8x128xf32>, vector<128x128xf32>, vector<8x128xf32> -> vector<8x128xf32>
    %13 = vector.broadcast %2 : vector<1x128xf32> to vector<8x128xf32>
    %14 = arith.addf %12, %13 : vector<8x128xf32>
    %cst_12 = arith.constant 0.000000e+00 : f32
    %15 = vector.broadcast %cst_12 : f32 to vector<8x128xf32>
    %16 = arith.maximumf %14, %15 : vector<8x128xf32>
    %c1_13 = arith.constant 1 : index
    %c0_14 = arith.constant 0 : index
    %c0_15 = arith.constant 0 : index
    %17 = vector.load %arg2[%c1_13, %c0_14, %c0_15] : memref<2x128x128xf32, #tpu.memory_space<vmem>>, vector<1x128x128xf32>
    %18 = vector.shape_cast %17 : vector<1x128x128xf32> to vector<128x128xf32>
    %cst_16 = arith.constant dense<0.000000e+00> : vector<8x128xf32>
    %19 = tpu.matmul %16, %18, %cst_16 {dimension_numbers = #tpu.dot_dimension_numbers<[1], [0], [0], [1], [0, 0, 1, 1], [], []>} : vector<8x128xf32>, vector<128x128xf32>, vector<8x128xf32> -> vector<8x128xf32>
    %20 = vector.broadcast %3 : vector<1x128xf32> to vector<8x128xf32>
    %21 = arith.addf %19, %20 : vector<8x128xf32>
    %cst_17 = arith.constant 0.000000e+00 : f32
    %22 = vector.broadcast %cst_17 : f32 to vector<8x128xf32>
    %23 = arith.subf %22, %21 : vector<8x128xf32>
    %24 = math.exp %23 : vector<8x128xf32>
    %cst_18 = arith.constant 1.000000e+00 : f32
    %25 = vector.broadcast %cst_18 : f32 to vector<8x128xf32>
    %26 = arith.addf %25, %24 : vector<8x128xf32>
    %27 = tpu.reciprocal %26 : vector<8x128xf32> -> vector<8x128xf32>
    %28 = tpu.iota {dimensions = array<i32: 1>} : vector<8x128xi32>
    %c2_i32 = arith.constant 2 : i32
    %29 = vector.broadcast %c2_i32 : i32 to vector<8x128xi32>
    %30 = arith.cmpi slt, %28, %29 : vector<8x128xi32>
    %31 = arith.select %30, %27, %21 : vector<8x128xi1>, vector<8x128xf32>
    %c0_19 = arith.constant 0 : index
    %c0_20 = arith.constant 0 : index
    %32 = vector.load %arg4[%c0_19, %c0_20] : memref<8x128xf32, #tpu.memory_space<vmem>>, vector<8x128xf32>
    tpu.vector_store %arg4[%c0_19, %c0_20], %31 {strides = array<i32>} : memref<8x128xf32, #tpu.memory_space<vmem>>, vector<8x128xf32>,
    return
  }
}

</mosaic_0001>

<bundles_post_ra>
// kernel: tpu_custom_call.1
= control target key start
LH: loop header
LB: loop body
LE: loop exit
PB: predicated region body
PF: predicated region fallthrough
CT: control target
= control target key end

     0   :  { %9 = vsyncpa [#allocation3], 0  ;;  %s755_s0 = inlined_call_operand.hbm [shape: f32[8,32], index: 0, kind: input, shape index: {}]   ;;  %s756_s1 = inlined_call_operand.hbm [shape: f32[32,128], index: 1, kind: input, shape index: {}]   ;;  %s757_s2 = inlined_call_operand.hbm [shape: f32[2,128,128], index: 2, kind: input, shape index: {}]   ;;  %s758_s3 = inlined_call_operand.vmem [shape: f32[3,128], index: 3, kind: input, shape index: {}]   ;;  %s759_s4 = inlined_call_operand.hbm [shape: f32[8,128], index: 4, kind: output, shape index: {}]  }
   0x1   :  { %10 = vsyncpa [#allocation6], 0 }
   0x2   :  { %11 = vsyncpa [#allocation4], 0  ;;  %s637_s15 = smov [#allocation5]   ;;  %s543_s19 = scalar_lea.hbm %s756_s1, 512 }
   0x3   :  { %s27_s16 = sshll.u32 %s637_s15, 4  ;;  %p544_p0 = scmp.ne.s32.totalorder %s756_s1, %s543_s19  ;;  %s28_s16 = int_to_ptr.vmem [resolvable:$true] %s27_s16 }
   0x4   :  { %p547_p1 = scmp.lt.u32.totalorder %s543_s19, %s756_s1 }
   0x6   :  { %p549_p2 = pnand %p547_p1, %p544_p0 }
   0x8   :  { %552 = shalt.err (!%p549_p2)
}
   0x9   :  { %s553_s24 = scalar_lea.vmem %s28_s16, 512  ;;  %p558_p4 = scmp.lt.s32.totalorder %s28_s16, %s28_s16 }
   0xa   :  { %p554_p3 = scmp.ne.s32.totalorder %s28_s16, %s553_s24  ;;  %p559_p5 = scmp.lt.s32.totalorder %s553_s24, %s553_s24 }
   0xc   :  { %p560_p6 = por %p559_p5, %p558_p4 }
   0xe   :  { %p561_p7 = pnand %p560_p6, %p554_p3 }
  0x10   :  { %564 = shalt.err (!%p561_p7)
}
  0x11   :  { %s638_s25 = smov 128   ;;  %s639_s26 = smov 8  }
  0x12   :  { %33 = dma.hbm_to_vmem [thread:$0]  %s756_s1, 512, %s28_s16, [#allocation6], %s638_s25, %s638_s25, %s639_s26  }
  0x13   :  { %s640_s29 = smov [#allocation2]   ;;  %s641_s5 = smov [#allocation7]  }
  0x14   :  { %s18_s30 = sshll.u32 %s640_s29, 4  ;;  %s39_s6 = sshll.u32 %s641_s5, 4  ;;  %s19_s30 = int_to_ptr.vmem [resolvable:$true] %s18_s30  ;;  %s40_s6 = int_to_ptr.vmem [resolvable:$true] %s39_s6 }
  0x15   :  { %s565_s9 = scalar_lea.hbm %s755_s0, 128 }
  0x16   :  { %p566_p8 = scmp.ne.s32.totalorder %s755_s0, %s565_s9  ;;  %p569_p9 = scmp.lt.u32.totalorder %s565_s9, %s755_s0 }
  0x18   :  { %p571_p10 = pnand %p569_p9, %p566_p8 }
  0x1a   :  { %574 = shalt.err (!%p571_p10)
}
  0x1b   :  { %s575_s1 = scalar_lea.vmem %s19_s30, 128  ;;  %p580_p12 = scmp.lt.s32.totalorder %s19_s30, %s19_s30 }
  0x1c   :  { %p576_p11 = scmp.ne.s32.totalorder %s19_s30, %s575_s1  ;;  %p581_p13 = scmp.lt.s32.totalorder %s575_s1, %s575_s1 }
  0x1e   :  { %p582_p0 = por %p581_p13, %p580_p12 }
  0x20   :  { %p583_p1 = pnand %p582_p0, %p576_p11 }
  0x22   :  { %586 = shalt.err (!%p583_p1)
}
  0x23   :  { %21 = dma.hbm_to_vmem [thread:$0]  %s755_s0, 128, %s19_s30, [#allocation3]  }
  0x24   :  { %s587_s18 = scalar_lea.hbm %s757_s2, 4096 }
  0x25   :  { %p588_p2 = scmp.ne.s32.totalorder %s757_s2, %s587_s18  ;;  %p591_p3 = scmp.lt.u32.totalorder %s587_s18, %s757_s2 }
  0x27   :  { %p593_p4 = pnand %p591_p3, %p588_p2 }
  0x29   :  { %596 = shalt.err (!%p593_p4)
}
  0x2a   :  { %s597_s23 = scalar_lea.vmem %s40_s6, 4096  ;;  %p602_p6 = scmp.lt.s32.totalorder %s40_s6, %s40_s6 }
  0x2b   :  { %p598_p5 = scmp.ne.s32.totalorder %s40_s6, %s597_s23  ;;  %p603_p7 = scmp.lt.s32.totalorder %s597_s23, %s597_s23 }
  0x2d   :  { %p604_p8 = por %p603_p7, %p602_p6 }
  0x2f   :  { %p605_p9 = pnand %p604_p8, %p598_p5 }
  0x31   :  { %608 = shalt.err (!%p605_p9)
}
  0x32   :  { %45 = dma.hbm_to_vmem [thread:$0]  %s757_s2, 4096, %s40_s6, [#allocation6], %s638_s25, %s638_s25, %s639_s26  }
  0x33   :  { %631 = dma.done.wait [#allocation3], 128  }
  0x34   :  { %632 = vsyncadd [#allocation3], 4294967168 }
  0x35   :  { %633 = dma.done.wait [#allocation6], 4608  }
  0x36   :  { %634 = vsyncadd [#allocation6], 4294962688  ;;  %v642_v0 = vmov 0.0|0.0   ;;  %vm643_vm0 = vmmov 0   ;;  %v644_v1 = vmov 0.0   ;;  %v61_v2 = vld [vmem:[#allocation5] sm:$0xff] }
  0x37   :  { %476 = vmatprep.subr.bf16.mxu0 %v642_v0  ;;  %403 = vmatprep.mubr.msk.f32.mxu0 %vm643_vm0, %v644_v1  ;;  %v62_v3 = vld [vmem:[#allocation5 + $0x8] sm:$0xff]  ;;  %v63_v4 = vld [vmem:[#allocation5 + $0x10] sm:$0xff]  ;;  %v64_v6 = vld [vmem:[#allocation5 + $0x18] sm:$0xff]  ;;  %vm69_vm1 = vcmask 261120   ;;  %s645_s30 = smov [#allocation8]  }
  0x38   :  { %482 = vmatprep.subr.bf16.mxu1 %v642_v0  ;;  %438 = vmatprep.mubr.msk.f32.mxu1 %vm643_vm0, %v644_v1  ;;  %v477_v5 = vpack.c.bf16 %v62_v3, %v61_v2  ;;  %v144_v7 = vld [vmem:[#allocation7] sm:$0xff]  ;;  %v145_v8 = vld [vmem:[#allocation7 + $0x8] sm:$0xff]  ;;  %v146_v9 = vld [vmem:[#allocation7 + $0x10] sm:$0xff]  ;;  %v480_v11 = vpack.c.bf16 %v64_v6, %v63_v4  ;;  %s342_s5 = sshll.u32 %s645_s30, 4  ;;  %s343_s5 = int_to_ptr.vmem [resolvable:$true] %s342_s5 }
  0x39   :  { %v147_v10 = vld [vmem:[#allocation7 + $0x18] sm:$0xff]  ;;  %v483_v12 = vpack.c.bf16 %v145_v8, %v144_v7  ;;  %v148_v14 = vld [vmem:[#allocation7 + $0x20] sm:$0xff]  ;;  %v149_v15 = vld [vmem:[#allocation7 + $0x28] sm:$0xff]  ;;  %s609_s6 = scalar_lea.vmem %s343_s5, 128  ;;  %p614_p11 = scmp.lt.s32.totalorder %s343_s5, %s343_s5 }
  0x3a   :  { %478 = vmatpush3.bf16.msra.mxu0 %v477_v5  ;;  %v486_v13 = vpack.c.bf16 %v147_v10, %v146_v9  ;;  %v57_v16 = vld [vmem:[#allocation2] sm:$0xff]  ;;  %v489_v17 = vpack.c.bf16 %v149_v15, %v148_v14  ;;  %v150_v18 = vld [vmem:[#allocation7 + $0x30] sm:$0xff]  ;;  %v152_v21 = vld [vmem:[#allocation7 + $0x40] sm:$0xff]  ;;  %p610_p10 = scmp.ne.s32.totalorder %s343_s5, %s609_s6  ;;  %p615_p12 = scmp.lt.s32.totalorder %s609_s6, %s609_s6 }
  0x3b   :  { %479 = vmatprep.subr.bf16.mxu0 %v642_v0  ;;  %484 = vmatpush3.bf16.msra.mxu1 %v483_v12  ;;  %v151_v19 = vld [vmem:[#allocation7 + $0x38] sm:$0xff]  ;;  %v153_v22 = vld [vmem:[#allocation7 + $0x48] sm:$0xff]  ;;  %v154_v24 = vld [vmem:[#allocation7 + $0x50] sm:$0xff] }
  0x3c   :  { %485 = vmatprep.subr.bf16.mxu1 %v642_v0  ;;  %v492_v20 = vpack.c.bf16 %v151_v19, %v150_v18  ;;  %v495_v23 = vpack.c.bf16 %v153_v22, %v152_v21  ;;  %v155_v25 = vld [vmem:[#allocation7 + $0x58] sm:$0xff]  ;;  %v156_v27 = vld [vmem:[#allocation7 + $0x60] sm:$0xff]  ;;  %v157_v28 = vld [vmem:[#allocation7 + $0x68] sm:$0xff]  ;;  %p616_p13 = por %p615_p12, %p614_p11 }
  0x3d   :  { %v498_v26 = vpack.c.bf16 %v155_v25, %v154_v24  ;;  %v501_v29 = vpack.c.bf16 %v157_v28, %v156_v27  ;;  %v158_v30 = vld [vmem:[#allocation7 + $0x70] sm:$0xff]  ;;  %v159_v31 = vld [vmem:[#allocation7 + $0x78] sm:$0xff]  ;;  %v236_v33 = vld [vmem:[#allocation7 + $0x80] sm:$0xff] }
  0x3e   :  { %481 = vmatpush3.bf16.msra.mxu0 %v480_v11  ;;  %v504_v32 = vpack.c.bf16 %v159_v31, %v158_v30  ;;  %v237_v34 = vld [vmem:[#allocation7 + $0x88] sm:$0xff]  ;;  %v238_v35 = vld [vmem:[#allocation7 + $0x90] sm:$0xff]  ;;  %v239_v37 = vld [vmem:[#allocation7 + $0x98] sm:$0xff]  ;;  %v331_v11 = vlaneseq  ;;  %p617_p0 = pnand %p616_p13, %p610_p10 }
  0x3f   :  { %506 = vmatprep.subr.bf16.mxu0 %v642_v0  ;;  %487 = vmatpush3.bf16.msra.mxu1 %v486_v13  ;;  %v507_v36 = vpack.c.bf16 %v237_v34, %v236_v33  ;;  %v510_v38 = vpack.c.bf16 %v239_v37, %v238_v35  ;;  %v240_v39 = vld [vmem:[#allocation7 + $0xa0] sm:$0xff]  ;;  %v241_v40 = vld [vmem:[#allocation7 + $0xa8] sm:$0xff]  ;;  %v242_v42 = vld [vmem:[#allocation7 + $0xb0] sm:$0xff] }
  0x40   :  { %488 = vmatprep.subr.bf16.mxu1 %v642_v0  ;;  %v513_v41 = vpack.c.bf16 %v241_v40, %v240_v39  ;;  %v243_v43 = vld [vmem:[#allocation7 + $0xb8] sm:$0xff]  ;;  %v244_v45 = vld [vmem:[#allocation7 + $0xc0] sm:$0xff]  ;;  %v245_v46 = vld [vmem:[#allocation7 + $0xc8] sm:$0xff]  ;;  %v332_v12 = vand.u32 127, %v331_v11 }
  0x41   :  { %404 = vmatmul.mubr.msk.f32.vlgmr.msra.gmra.mrb[0].mxu0 %vm69_vm1, %v57_v16  ;;  %v516_v44 = vpack.c.bf16 %v243_v43, %v242_v42  ;;  %v519_v47 = vpack.c.bf16 %v245_v46, %v244_v45  ;;  %v246_v48 = vld [vmem:[#allocation7 + $0xd0] sm:$0xff]  ;;  %v247_v49 = vld [vmem:[#allocation7 + $0xd8] sm:$0xff]  ;;  %v248_v51 = vld [vmem:[#allocation7 + $0xe0] sm:$0xff] }
  0x42   :  { %473 = vmatprep.mubr.msk.f32.mxu0 %vm643_vm0, %v644_v1  ;;  %508 = vmatpush3.bf16.msra.mxu0 %v507_v36  ;;  %v522_v50 = vpack.c.bf16 %v247_v49, %v246_v48  ;;  %v249_v52 = vld [vmem:[#allocation7 + $0xe8] sm:$0xff]  ;;  %v352_v54 = vld [vmem:[%s758_s3] ss:$0 sm:$0xff]  ;;  %v250_v59 = vld [vmem:[#allocation7 + $0xf0] sm:$0xff]  ;;  %vm333_vm2 = vcmp.lt.s32.totalorder %v332_v12, 2 }
  0x43   :  { %490 = vmatpush3.bf16.msra.mxu1 %v489_v17  ;;  %509 = vmatprep.subr.bf16.mxu0 %v642_v0  ;;  %v525_v53 = vpack.c.bf16 %v249_v52, %v248_v51  ;;  %v251_v60 = vld [vmem:[#allocation7 + $0xf8] sm:$0xff] }
  0x44   :  { %491 = vmatprep.subr.bf16.mxu1 %v642_v0  ;;  %v528_v61 = vpack.c.bf16 %v251_v60, %v250_v59  ;;  %v354_v62 = vld [vmem:[%s758_s3 + $0x1] ss:$0 sm:$0xff]  ;;  %v355_v3 = vld [vmem:[%s758_s3 + $0x2] ss:$0 sm:$0xff] }
  0x46   :  { %511 = vmatpush3.bf16.msra.mxu0 %v510_v38 }
  0x47   :  { %493 = vmatpush3.bf16.msra.mxu1 %v492_v20  ;;  %512 = vmatprep.subr.bf16.mxu0 %v642_v0 }
  0x48   :  { %494 = vmatprep.subr.bf16.mxu1 %v642_v0 }
  0x4a   :  { %514 = vmatpush3.bf16.msra.mxu0 %v513_v41 }
  0x4b   :  { %496 = vmatpush3.bf16.msra.mxu1 %v495_v23  ;;  %515 = vmatprep.subr.bf16.mxu0 %v642_v0 }
  0x4c   :  { %497 = vmatprep.subr.bf16.mxu1 %v642_v0 }
  0x4e   :  { %517 = vmatpush3.bf16.msra.mxu0 %v516_v44 }
  0x4f   :  { %499 = vmatpush3.bf16.msra.mxu1 %v498_v26  ;;  %518 = vmatprep.subr.bf16.mxu0 %v642_v0 }
  0x50   :  { %500 = vmatprep.subr.bf16.mxu1 %v642_v0 }
  0x52   :  { %520 = vmatpush3.bf16.msra.mxu0 %v519_v47 }
  0x53   :  { %502 = vmatpush3.bf16.msra.mxu1 %v501_v29  ;;  %521 = vmatprep.subr.bf16.mxu0 %v642_v0 }
  0x54   :  { %503 = vmatprep.subr.bf16.mxu1 %v642_v0 }
  0x56   :  { %523 = vmatpush3.bf16.msra.mxu0 %v522_v50 }
  0x57   :  { %505 = vmatpush3.bf16.msra.mxu1 %v504_v32  ;;  %524 = vmatprep.subr.bf16.mxu0 %v642_v0 }
  0x5a   :  { %526 = vmatpush3.bf16.msra.mxu0 %v525_v53 }
  0x5b   :  { %527 = vmatprep.subr.bf16.mxu0 %v642_v0 }
  0x5e   :  { %529 = vmatpush3.bf16.msra.mxu0 %v528_v61 }
 0x114   :  { %v139_v55 = vpop.f32.mrb[0].mxu0 }
 0x115   :  { %v140_v56 = vadd.f32 %v352_v54, %v139_v55  ;;  %v405_v57 = vpop.f32.mrb[1].mxu0 }
 0x117   :  { %v143_v58 = vmax.f32 %v140_v56, 0.0 }
 0x119   :  { %439 = vmatmul.mubr.f32.vlgmr.msra.gmra.mrb[0].mxu1 %v143_v58 }
 0x1ec   :  { %v230_v63 = vpop.f32.mrb[0].mxu1 }
 0x1ed   :  { %v231_v1 = vadd.f32 %v354_v62, %v230_v63  ;;  %v440_v0 = vpop.f32.mrb[1].mxu1 }
 0x1ef   :  { %v234_v2 = vmax.f32 %v231_v1, 0.0 }
 0x1f1   :  { %474 = vmatmul.mubr.f32.vlgmr.msra.gmra.mrb[2].mxu0 %v234_v2 }
 0x2c4   :  { %v322_v4 = vpop.f32.mrb[2].mxu0 }
 0x2c5   :  { %v323_v5 = vadd.f32 %v355_v3, %v322_v4  ;;  %v475_v6 = vpop.f32.mrb[3].mxu0 }
 0x2c7   :  { %v326_v7 = vsub.f32 0.0, %v323_v5 }
 0x2c9   :  { %v327_v8 = vmul.f32 1.442695, %v326_v7 }
 0x2cb   :  { %539 = vpow2.f32 %v327_v8 }
 0x2d5   :  { %v540_v9 = vpop.eup %539 }
 0x2d6   :  { %v329_v10 = vadd.f32 1.0, %v540_v9 }
 0x2d8   :  { %541 = vrcp.f32 %v329_v10 }
 0x2e2   :  { %v542_v13 = vpop.eup %541 }
 0x2e3   :  { %v334_v14 = vsel %vm333_vm2, %v542_v13, %v323_v5 }
 0x2e4   :  { %335 = vst [vmem:[#allocation8] sm:$0xff] %v334_v14 }
 0x2e5   :  { %620 = shalt.err (!%p617_p0)
}
 0x2e6   :  { %s621_s8 = scalar_lea.hbm %s759_s4, 128 }
 0x2e7   :  { %p622_p1 = scmp.ne.s32.totalorder %s759_s4, %s621_s8  ;;  %p625_p2 = scmp.lt.u32.totalorder %s621_s8, %s759_s4 }
 0x2e9   :  { %p627_p3 = pnand %p625_p2, %p622_p1 }
 0x2eb   :  { %630 = shalt.err (!%p627_p3)
}
 0x2ec   :  { %345 = dma.vmem_to_hbm [thread:$0]  %s343_s5, 128, %s759_s4, [#allocation4]  }
 0x2ed   :  { %635 = dma.done.wait [#allocation4], 128  }
 0x2ee   :  { %636 = vsyncadd [#allocation4], 4294967168 }
 0x2ef   :  { %349 = vsyncpa [#allocation3], 1 }
 0x2f0   :  { %350 = vsyncpa [#allocation6], 1 }
 0x2f1   :  { %351 = vsyncpa [#allocation4], 1 }

</bundles_post_ra>
